<compile_context>
chip_gen: v5e
topology: v5e:2x2
jax: 0.10.0
libtpu: 0.0.40
codegen_flags: <defaults>
</compile_context>

<pallas_src>
import functools
import math

import jax
import jax.numpy as jnp
from jax.experimental import pallas as pl
from jax.experimental.pallas import tpu as pltpu


def _dng_kernel(x_ref, p_ref, o_ref, *, L, K, C, H, eps):
    """One (C, TILE) lane tile: channels on sublanes, sequence on lanes."""
    TL = x_ref.shape[1]
    pad = K // 2

    # Column layout of the packed parameter block (see _pack_params).
    col_bdw = K
    col_bpw = K + 1
    col_gam = K + 2
    col_bet = K + 3
    col_bout = K + 4
    col_wpw = K + 5            # C columns: w_pw^T  (H, C)
    col_wout = K + 5 + C       # H columns: w_out^T (C, H)

    x = x_ref[...].astype(jnp.float32)                          # (C, TL)

    # Lane position of each element inside its own sequence. Tiles hold whole
    # sequences (TILE % L == 0), so local lane index mod L == global pos mod L.
    l_idx = jax.lax.broadcasted_iota(jnp.int32, (C, TL), 1) % L

    # ---- depthwise conv1d (cross-correlation, zero padding, groups == C) ----
    acc = x * p_ref[:C, pad:pad + 1] + p_ref[:C, col_bdw:col_bdw + 1]
    for k in range(K):                                          # static unroll
        d = k - pad
        if d == 0:
            continue
        # Circular lane roll on the XLU (non-negative shift); wrap-around and
        # cross-sequence taps are zeroed by the mask == Conv1d zero padding.
        shifted = pltpu.roll(x, shift=(-d) % TL, axis=1)        # [:, n] <- x[:, n+d]
        valid = (l_idx + d >= 0) & (l_idx + d < L)
        acc = acc + jnp.where(valid, shifted, 0.0) * p_ref[:C, k:k + 1]
    hdw = jnp.maximum(acc, 0.0)                                 # ReLU, (C, TL)

    # ---- pointwise 1x1 conv C -> H on the MXU (lane-dense N = sequence) ----
    h = jnp.dot(p_ref[:H, col_wpw:col_wpw + C], hdw,
                preferred_element_type=jnp.float32)             # (H, TL)
    h = h + p_ref[:H, col_bpw:col_bpw + 1]

    # ---- LayerNorm over the hidden (sublane) dim, biased variance ----------
    mu = jnp.mean(h, axis=0, keepdims=True)
    var = jnp.mean((h - mu) ** 2, axis=0, keepdims=True)
    hn = (h - mu) * jax.lax.rsqrt(var + eps)
    hn = hn * p_ref[:H, col_gam:col_gam + 1] + p_ref[:H, col_bet:col_bet + 1]

    # ---- output 1x1 conv H -> C on the MXU, tanh, residual ------------------
    y = jnp.dot(p_ref[:C, col_wout:col_wout + H], hn,
                preferred_element_type=jnp.float32)             # (C, TL)
    y = jnp.tanh(y + p_ref[:C, col_bout:col_bout + 1])

    o_ref[...] = (x + y).astype(o_ref.dtype)                    # dense store


def _pack_params(params, C, H, K):
    """All small parameters in one f32 block (single resident DMA).

    Rows = channel / hidden index (sublanes). Columns:
      [0, K)              w_dw taps            (rows 0..C-1), p[c, k] = w_dw[k, c]
      K                   b_dw                 (rows 0..C-1)
      K+1, K+2, K+3       b_pw, gamma, beta    (rows 0..H-1)
      K+4                 b_out                (rows 0..C-1)
      [K+5, K+5+C)        w_pw^T   (H, C)
      [K+5+C, K+5+C+H)    w_out^T  (C, H)
    """
    f32 = jnp.float32
    rows = ((max(C, H) + 7) // 8) * 8
    cols = ((K + 5 + C + H + 127) // 128) * 128
    p = jnp.zeros((rows, cols), f32)
    p = p.at[:C, 0:K].set(params["w_dw"].astype(f32).T)
    p = p.at[:C, K].set(params["b_dw"].astype(f32))
    p = p.at[:H, K + 1].set(params["b_pw"].astype(f32))
    p = p.at[:H, K + 2].set(params["gamma"].astype(f32))
    p = p.at[:H, K + 3].set(params["beta"].astype(f32))
    p = p.at[:C, K + 4].set(params["b_out"].astype(f32))
    p = p.at[:H, K + 5:K + 5 + C].set(params["w_pw"].astype(f32).T)
    p = p.at[:C, K + 5 + C:K + 5 + C + H].set(params["w_out"].astype(f32).T)
    return p


def _pick_lane_tile(R, L, max_tile):
    """Largest lane tile <= max_tile that divides R, holds whole sequences
    (multiple of L) and is a multiple of 128 (unless it is the full array)."""
    if R <= max_tile:
        return R
    base = (L * 128) // math.gcd(L, 128)            # lcm(L, 128)
    if R % base:
        return R          # odd shape: one full block (correct, unpipelined)
    tl = base
    while tl * 2 <= max_tile and R % (tl * 2) == 0:
        tl *= 2
    return tl


def depthwise_nuisance_generator(x, params, *, eps=1e-5, max_lane_tile=16384):
    B, L, C = x.shape
    K = params["w_dw"].shape[0]
    H = params["w_pw"].shape[1]
    R = B * L

    packed = _pack_params(params, C, H, K)

    # Channels on sublanes, sequence on lanes (lane-dense DMAs/stores).
    xt = x.reshape(R, C).T                                      # (C, R)

    tl = _pick_lane_tile(R, L, max_lane_tile)
    grid = (R // tl,)

    kernel = functools.partial(_dng_kernel, L=L, K=K, C=C, H=H, eps=eps)
    out_t = pl.pallas_call(
        kernel,
        out_shape=jax.ShapeDtypeStruct((C, R), x.dtype),
        grid=grid,
        in_specs=[
            pl.BlockSpec((C, tl), lambda i: (0, i)),            # x lane tile
            pl.BlockSpec(packed.shape, lambda i: (0, 0)),       # params, resident
        ],
        out_specs=pl.BlockSpec((C, tl), lambda i: (0, i)),
        compiler_params=pltpu.CompilerParams(
            dimension_semantics=("parallel",),                  # v7x: 2 TCs shard tiles
            vmem_limit_bytes=32 * 1024 * 1024,                  # explicit budget (v7x: 64 MiB phys)
        ),
    )(xt, packed)
    return out_t.T.reshape(B, L, C)


def make_params(key, input_dim=4, hidden_dim=32, kernel_size=5):
    ks = jax.random.split(key, 6)
    C, H, K = input_dim, hidden_dim, kernel_size
    f32 = jnp.float32
    return {
        # w_dw[k, c] == torch depthwise.weight[c, 0, k]
        "w_dw": 0.1 * jax.random.normal(ks[0], (K, C), f32),
        "b_dw": 0.1 * jax.random.normal(ks[1], (C,), f32),
        # w_pw[c, h] == torch pointwise.weight[h, c, 0]
        "w_pw": 0.1 * jax.random.normal(ks[2], (C, H), f32),
        "b_pw": 0.1 * jax.random.normal(ks[3], (H,), f32),
        "gamma": jnp.ones((H,), f32),
        "beta": jnp.zeros((H,), f32),
        # w_out[h, c] == torch output_layer.weight[c, h, 0]
        "w_out": 0.1 * jax.random.normal(ks[4], (H, C), f32),
        "b_out": 0.1 * jax.random.normal(ks[5], (C,), f32),
    }


def reference(x, p, eps=1e-5):
    """Pure-JAX reference mirroring the PyTorch forward."""
    B, L, C = x.shape
    K = p["w_dw"].shape[0]
    pad = K // 2
    xp = jnp.pad(x, ((0, 0), (pad, pad), (0, 0)))
    dw = sum(xp[:, k:k + L, :] * p["w_dw"][k][None, None, :] for k in range(K))
    dw = dw + p["b_dw"]
    h = jax.nn.relu(dw)
    h = h @ p["w_pw"] + p["b_pw"]
    mu = h.mean(-1, keepdims=True)
    var = ((h - mu) ** 2).mean(-1, keepdims=True)
    hn = (h - mu) / jnp.sqrt(var + eps) * p["gamma"] + p["beta"]
    y = jnp.tanh(hn @ p["w_out"] + p["b_out"])
    return x + y


if __name__ == "__main__":
    key = jax.random.PRNGKey(0)
    k_x, k_p = jax.random.split(key)

    B, L, C, H, K = 2, 16, 4, 32, 5
    x = jax.random.normal(k_x, (B, L, C), jnp.float32)
    params = make_params(k_p, input_dim=C, hidden_dim=H, kernel_size=K)

    out = depthwise_nuisance_generator(x, params)
    out = jax.block_until_ready(out)

    ref = reference(x, params)
    assert out.shape == (B, L, C)
    assert out.dtype == x.dtype
    assert jnp.allclose(out, ref, rtol=1e-5, atol=1e-5), "mismatch vs reference"

    print("KERNEL_OK")
</pallas_src>

<mosaic_0001>
module attributes {stable_mosaic.version = 11 : i64} {
  func.func @_dng_kernel(%arg0: i32, %arg1: memref<4x32xf32, #tpu.memory_space<vmem>>, %arg2: memref<32x128xf32, #tpu.memory_space<vmem>>, %arg3: memref<4x32xf32, #tpu.memory_space<vmem>>) attributes {dimension_semantics = [#tpu.dimension_semantics<parallel>], iteration_bounds = array<i64: 1>, scalar_prefetch = 0 : i64, scratch_operands = 0 : i64, tpu.core_type = #tpu.core_type<tc>, window_params = [{transform_indices = @transform_0, window_bounds = array<i64: 4, 32>}, {pipeline_mode = #tpu.pipeline_mode<synchronous>, transform_indices = @transform_1, window_bounds = array<i64: 32, 128>}, {transform_indices = @transform_2, window_bounds = array<i64: 4, 32>}]} {
    %c0 = arith.constant 0 : index
    %c0_0 = arith.constant 0 : index
    %0 = vector.load %arg1[%c0, %c0_0] : memref<4x32xf32, #tpu.memory_space<vmem>>, vector<4x32xf32>
    %1 = tpu.iota {dimensions = array<i32: 1>} : vector<4x32xi32>
    %c16_i32 = arith.constant 16 : i32
    %c0_i32 = arith.constant 0 : i32
    %2 = arith.cmpi eq, %c16_i32, %c0_i32 : i32
    %c1_i32 = arith.constant 1 : i32
    %3 = arith.select %2, %c1_i32, %c16_i32 : i32
    %4 = vector.broadcast %3 : i32 to vector<4x32xi32>
    %5 = arith.remsi %1, %4 : vector<4x32xi32>
    %c0_i32_1 = arith.constant 0 : i32
    %6 = vector.broadcast %c0_i32_1 : i32 to vector<4x32xi32>
    %7 = arith.cmpi ne, %5, %6 : vector<4x32xi32>
    %c0_i32_2 = arith.constant 0 : i32
    %8 = vector.broadcast %c0_i32_2 : i32 to vector<4x32xi32>
    %9 = arith.cmpi slt, %5, %8 : vector<4x32xi32>
    %c0_i32_3 = arith.constant 0 : i32
    %10 = arith.cmpi slt, %3, %c0_i32_3 : i32
    %11 = vector.broadcast %10 : i1 to vector<4x32xi1>
    %12 = vector.broadcast %11 : vector<4x32xi1> to vector<4x32xi1>
    %13 = arith.xori %9, %12 : vector<4x32xi1>
    %14 = arith.andi %13, %7 : vector<4x32xi1>
    %15 = vector.broadcast %3 : i32 to vector<4x32xi32>
    %16 = arith.addi %5, %15 : vector<4x32xi32>
    %17 = arith.select %14, %16, %5 : vector<4x32xi1>, vector<4x32xi32>
    %c0_4 = arith.constant 0 : index
    %c2 = arith.constant 2 : index
    %18 = vector.load %arg2[%c0_4, %c2] : memref<32x128xf32, #tpu.memory_space<vmem>>, vector<4x1xf32>
    %19 = vector.broadcast %18 : vector<4x1xf32> to vector<4x32xf32>
    %20 = arith.mulf %0, %19 : vector<4x32xf32>
    %c0_5 = arith.constant 0 : index
    %c5 = arith.constant 5 : index
    %21 = vector.load %arg2[%c0_5, %c5] : memref<32x128xf32, #tpu.memory_space<vmem>>, vector<4x1xf32>
    %22 = vector.broadcast %21 : vector<4x1xf32> to vector<4x32xf32>
    %23 = arith.addf %20, %22 : vector<4x32xf32>
    %c2_i32 = arith.constant 2 : i32
    %24 = tpu.dynamic_rotate %0 by %c2_i32 dim 1 : vector<4x32xf32>, i32 -> vector<4x32xf32>
    %c-2_i32 = arith.constant -2 : i32
    %25 = vector.broadcast %c-2_i32 : i32 to vector<4x32xi32>
    %26 = arith.addi %17, %25 : vector<4x32xi32>
    %c0_i32_6 = arith.constant 0 : i32
    %27 = vector.broadcast %c0_i32_6 : i32 to vector<4x32xi32>
    %28 = arith.cmpi sge, %26, %27 : vector<4x32xi32>
    %c-2_i32_7 = arith.constant -2 : i32
    %29 = vector.broadcast %c-2_i32_7 : i32 to vector<4x32xi32>
    %30 = arith.addi %17, %29 : vector<4x32xi32>
    %c16_i32_8 = arith.constant 16 : i32
    %31 = vector.broadcast %c16_i32_8 : i32 to vector<4x32xi32>
    %32 = arith.cmpi slt, %30, %31 : vector<4x32xi32>
    %33 = arith.andi %28, %32 : vector<4x32xi1>
    %cst = arith.constant 0.000000e+00 : f32
    %34 = vector.broadcast %cst : f32 to vector<4x32xf32>
    %35 = arith.select %33, %24, %34 : vector<4x32xi1>, vector<4x32xf32>
    %c0_9 = arith.constant 0 : index
    %c0_10 = arith.constant 0 : index
    %36 = vector.load %arg2[%c0_9, %c0_10] : memref<32x128xf32, #tpu.memory_space<vmem>>, vector<4x1xf32>
    %37 = vector.broadcast %36 : vector<4x1xf32> to vector<4x32xf32>
    %38 = arith.mulf %35, %37 : vector<4x32xf32>
    %39 = arith.addf %23, %38 : vector<4x32xf32>
    %c1_i32_11 = arith.constant 1 : i32
    %40 = tpu.dynamic_rotate %0 by %c1_i32_11 dim 1 : vector<4x32xf32>, i32 -> vector<4x32xf32>
    %c-1_i32 = arith.constant -1 : i32
    %41 = vector.broadcast %c-1_i32 : i32 to vector<4x32xi32>
    %42 = arith.addi %17, %41 : vector<4x32xi32>
    %c0_i32_12 = arith.constant 0 : i32
    %43 = vector.broadcast %c0_i32_12 : i32 to vector<4x32xi32>
    %44 = arith.cmpi sge, %42, %43 : vector<4x32xi32>
    %c-1_i32_13 = arith.constant -1 : i32
    %45 = vector.broadcast %c-1_i32_13 : i32 to vector<4x32xi32>
    %46 = arith.addi %17, %45 : vector<4x32xi32>
    %c16_i32_14 = arith.constant 16 : i32
    %47 = vector.broadcast %c16_i32_14 : i32 to vector<4x32xi32>
    %48 = arith.cmpi slt, %46, %47 : vector<4x32xi32>
    %49 = arith.andi %44, %48 : vector<4x32xi1>
    %cst_15 = arith.constant 0.000000e+00 : f32
    %50 = vector.broadcast %cst_15 : f32 to vector<4x32xf32>
    %51 = arith.select %49, %40, %50 : vector<4x32xi1>, vector<4x32xf32>
    %c0_16 = arith.constant 0 : index
    %c1 = arith.constant 1 : index
    %52 = vector.load %arg2[%c0_16, %c1] : memref<32x128xf32, #tpu.memory_space<vmem>>, vector<4x1xf32>
    %53 = vector.broadcast %52 : vector<4x1xf32> to vector<4x32xf32>
    %54 = arith.mulf %51, %53 : vector<4x32xf32>
    %55 = arith.addf %39, %54 : vector<4x32xf32>
    %c31_i32 = arith.constant 31 : i32
    %56 = tpu.dynamic_rotate %0 by %c31_i32 dim 1 : vector<4x32xf32>, i32 -> vector<4x32xf32>
    %c1_i32_17 = arith.constant 1 : i32
    %57 = vector.broadcast %c1_i32_17 : i32 to vector<4x32xi32>
    %58 = arith.addi %17, %57 : vector<4x32xi32>
    %c0_i32_18 = arith.constant 0 : i32
    %59 = vector.broadcast %c0_i32_18 : i32 to vector<4x32xi32>
    %60 = arith.cmpi sge, %58, %59 : vector<4x32xi32>
    %c1_i32_19 = arith.constant 1 : i32
    %61 = vector.broadcast %c1_i32_19 : i32 to vector<4x32xi32>
    %62 = arith.addi %17, %61 : vector<4x32xi32>
    %c16_i32_20 = arith.constant 16 : i32
    %63 = vector.broadcast %c16_i32_20 : i32 to vector<4x32xi32>
    %64 = arith.cmpi slt, %62, %63 : vector<4x32xi32>
    %65 = arith.andi %60, %64 : vector<4x32xi1>
    %cst_21 = arith.constant 0.000000e+00 : f32
    %66 = vector.broadcast %cst_21 : f32 to vector<4x32xf32>
    %67 = arith.select %65, %56, %66 : vector<4x32xi1>, vector<4x32xf32>
    %c0_22 = arith.constant 0 : index
    %c3 = arith.constant 3 : index
    %68 = vector.load %arg2[%c0_22, %c3] : memref<32x128xf32, #tpu.memory_space<vmem>>, vector<4x1xf32>
    %69 = vector.broadcast %68 : vector<4x1xf32> to vector<4x32xf32>
    %70 = arith.mulf %67, %69 : vector<4x32xf32>
    %71 = arith.addf %55, %70 : vector<4x32xf32>
    %c30_i32 = arith.constant 30 : i32
    %72 = tpu.dynamic_rotate %0 by %c30_i32 dim 1 : vector<4x32xf32>, i32 -> vector<4x32xf32>
    %c2_i32_23 = arith.constant 2 : i32
    %73 = vector.broadcast %c2_i32_23 : i32 to vector<4x32xi32>
    %74 = arith.addi %17, %73 : vector<4x32xi32>
    %c0_i32_24 = arith.constant 0 : i32
    %75 = vector.broadcast %c0_i32_24 : i32 to vector<4x32xi32>
    %76 = arith.cmpi sge, %74, %75 : vector<4x32xi32>
    %c2_i32_25 = arith.constant 2 : i32
    %77 = vector.broadcast %c2_i32_25 : i32 to vector<4x32xi32>
    %78 = arith.addi %17, %77 : vector<4x32xi32>
    %c16_i32_26 = arith.constant 16 : i32
    %79 = vector.broadcast %c16_i32_26 : i32 to vector<4x32xi32>
    %80 = arith.cmpi slt, %78, %79 : vector<4x32xi32>
    %81 = arith.andi %76, %80 : vector<4x32xi1>
    %cst_27 = arith.constant 0.000000e+00 : f32
    %82 = vector.broadcast %cst_27 : f32 to vector<4x32xf32>
    %83 = arith.select %81, %72, %82 : vector<4x32xi1>, vector<4x32xf32>
    %c0_28 = arith.constant 0 : index
    %c4 = arith.constant 4 : index
    %84 = vector.load %arg2[%c0_28, %c4] : memref<32x128xf32, #tpu.memory_space<vmem>>, vector<4x1xf32>
    %85 = vector.broadcast %84 : vector<4x1xf32> to vector<4x32xf32>
    %86 = arith.mulf %83, %85 : vector<4x32xf32>
    %87 = arith.addf %71, %86 : vector<4x32xf32>
    %cst_29 = arith.constant 0.000000e+00 : f32
    %88 = vector.broadcast %cst_29 : f32 to vector<4x32xf32>
    %89 = arith.maximumf %87, %88 : vector<4x32xf32>
    %c0_30 = arith.constant 0 : index
    %c10 = arith.constant 10 : index
    %90 = vector.load %arg2[%c0_30, %c10] : memref<32x128xf32, #tpu.memory_space<vmem>>, vector<32x4xf32>
    %cst_31 = arith.constant dense<0.000000e+00> : vector<32x32xf32>
    %91 = tpu.matmul %90, %89, %cst_31 {dimension_numbers = #tpu.dot_dimension_numbers<[1], [0], [0], [1], [0, 0, 1, 1], [], []>} : vector<32x4xf32>, vector<4x32xf32>, vector<32x32xf32> -> vector<32x32xf32>
    %c0_32 = arith.constant 0 : index
    %c6 = arith.constant 6 : index
    %92 = vector.load %arg2[%c0_32, %c6] : memref<32x128xf32, #tpu.memory_space<vmem>>, vector<32x1xf32>
    %93 = vector.broadcast %92 : vector<32x1xf32> to vector<32x32xf32>
    %94 = arith.addf %91, %93 : vector<32x32xf32>
    %cst_33 = arith.constant dense<0.000000e+00> : vector<32xf32>
    %95 = vector.multi_reduction <add>, %94, %cst_33 [0] : vector<32x32xf32> to vector<32xf32>
    %96 = vector.shape_cast %95 : vector<32xf32> to vector<1x32xf32>
    %cst_34 = arith.constant 3.200000e+01 : f32
    %97 = vector.broadcast %cst_34 : f32 to vector<1x32xf32>
    %98 = arith.divf %96, %97 : vector<1x32xf32>
    %99 = vector.broadcast %98 : vector<1x32xf32> to vector<32x32xf32>
    %100 = arith.subf %94, %99 : vector<32x32xf32>
    %101 = arith.mulf %100, %100 : vector<32x32xf32>
    %cst_35 = arith.constant dense<0.000000e+00> : vector<32xf32>
    %102 = vector.multi_reduction <add>, %101, %cst_35 [0] : vector<32x32xf32> to vector<32xf32>
    %103 = vector.shape_cast %102 : vector<32xf32> to vector<1x32xf32>
    %cst_36 = arith.constant 3.200000e+01 : f32
    %104 = vector.broadcast %cst_36 : f32 to vector<1x32xf32>
    %105 = arith.divf %103, %104 : vector<1x32xf32>
    %106 = vector.broadcast %98 : vector<1x32xf32> to vector<32x32xf32>
    %107 = arith.subf %94, %106 : vector<32x32xf32>
    %cst_37 = arith.constant 9.99999974E-6 : f32
    %108 = vector.broadcast %cst_37 : f32 to vector<1x32xf32>
    %109 = arith.addf %105, %108 : vector<1x32xf32>
    %110 = math.rsqrt %109 : vector<1x32xf32>
    %111 = vector.broadcast %110 : vector<1x32xf32> to vector<32x32xf32>
    %112 = arith.mulf %107, %111 : vector<32x32xf32>
    %c0_38 = arith.constant 0 : index
    %c7 = arith.constant 7 : index
    %113 = vector.load %arg2[%c0_38, %c7] : memref<32x128xf32, #tpu.memory_space<vmem>>, vector<32x1xf32>
    %114 = vector.broadcast %113 : vector<32x1xf32> to vector<32x32xf32>
    %115 = arith.mulf %112, %114 : vector<32x32xf32>
    %c0_39 = arith.constant 0 : index
    %c8 = arith.constant 8 : index
    %116 = vector.load %arg2[%c0_39, %c8] : memref<32x128xf32, #tpu.memory_space<vmem>>, vector<32x1xf32>
    %117 = vector.broadcast %116 : vector<32x1xf32> to vector<32x32xf32>
    %118 = arith.addf %115, %117 : vector<32x32xf32>
    %c0_40 = arith.constant 0 : index
    %c14 = arith.constant 14 : index
    %119 = vector.load %arg2[%c0_40, %c14] : memref<32x128xf32, #tpu.memory_space<vmem>>, vector<4x32xf32>
    %cst_41 = arith.constant dense<0.000000e+00> : vector<4x32xf32>
    %120 = tpu.matmul %119, %118, %cst_41 {dimension_numbers = #tpu.dot_dimension_numbers<[1], [0], [0], [1], [0, 0, 1, 1], [], []>} : vector<4x32xf32>, vector<32x32xf32>, vector<4x32xf32> -> vector<4x32xf32>
    %c0_42 = arith.constant 0 : index
    %c9 = arith.constant 9 : index
    %121 = vector.load %arg2[%c0_42, %c9] : memref<32x128xf32, #tpu.memory_space<vmem>>, vector<4x1xf32>
    %122 = vector.broadcast %121 : vector<4x1xf32> to vector<4x32xf32>
    %123 = arith.addf %120, %122 : vector<4x32xf32>
    %124 = math.tanh %123 : vector<4x32xf32>
    %125 = arith.addf %0, %124 : vector<4x32xf32>
    %c0_43 = arith.constant 0 : index
    %c0_44 = arith.constant 0 : index
    %126 = vector.load %arg3[%c0_43, %c0_44] : memref<4x32xf32, #tpu.memory_space<vmem>>, vector<4x32xf32>
    tpu.vector_store %arg3[%c0_43, %c0_44], %125 {strides = array<i32>} : memref<4x32xf32, #tpu.memory_space<vmem>>, vector<4x32xf32>,
    return
  }
  func.func @transform_0(%arg0: i32) -> (i32, i32) {
    %c0_i32 = arith.constant 0 : i32
    %c0_i32_0 = arith.constant 0 : i32
    return %c0_i32, %arg0 : i32, i32
  }
  func.func @transform_1(%arg0: i32) -> (i32, i32) {
    %c0_i32 = arith.constant 0 : i32
    %c0_i32_0 = arith.constant 0 : i32
    %c0_i32_1 = arith.constant 0 : i32
    return %c0_i32, %c0_i32_0 : i32, i32
  }
  func.func @transform_2(%arg0: i32) -> (i32, i32) {
    %c0_i32 = arith.constant 0 : i32
    %c0_i32_0 = arith.constant 0 : i32
    return %c0_i32, %arg0 : i32, i32
  }
}

</mosaic_0001>

<bundles_post_ra>
// kernel: tpu_custom_call.1
= control target key start
LH: loop header
LB: loop body
LE: loop exit
PB: predicated region body
PF: predicated region fallthrough
CT: control target
= control target key end

     0   :  { %7 = vsyncpa [#allocation3], 0  ;;  %s578_s0 = inlined_call_operand.hbm [shape: f32[4,32], index: 0, kind: input, shape index: {}]   ;;  %s579_s1 = inlined_call_operand.hbm [shape: f32[32,128], index: 1, kind: input, shape index: {}]   ;;  %s580_s2 = inlined_call_operand.hbm [shape: f32[4,32], index: 2, kind: output, shape index: {}]  }
   0x1   :  { %8 = vsyncpa [#allocation6], 0 }
   0x2   :  { %9 = vsyncpa [#allocation4], 0  ;;  %s15_s11 = sshll.u32 %s578_s0, 4  ;;  %s487_s12 = smov [#allocation2]   ;;  %s16_s11 = int_to_ptr.hbm [resolvable:$true] %s15_s11 }
   0x3   :  { %s17_s13 = sshll.u32 %s487_s12, 4  ;;  %s25_s16 = sshll.u32 %s579_s1, 4  ;;  %s18_s13 = int_to_ptr.vmem [resolvable:$true] %s17_s13  ;;  %s26_s16 = int_to_ptr.hbm [resolvable:$true] %s25_s16 }
   0x4   :  { %20 = dma.hbm_to_vmem [thread:$0]  %s16_s11, 64, %s18_s13, [#allocation3]  }
   0x5   :  { %s488_s17 = smov [#allocation5]   ;;  %s489_s19 = smov 128  }
   0x6   :  { %s27_s18 = sshll.u32 %s488_s17, 4  ;;  %s490_s20 = smov 8   ;;  %s28_s18 = int_to_ptr.vmem [resolvable:$true] %s27_s18 }
   0x7   :  { %33 = dma.hbm_to_vmem [thread:$0]  %s26_s16, 512, %s28_s18, [#allocation6], %s489_s19, %s489_s19, %s490_s20  }
   0x8   :  { %481 = dma.done.wait [#allocation3], 64  }
   0x9   :  { %482 = vsyncadd [#allocation3], 4294967232 }
   0xa   :  { %483 = dma.done.wait [#allocation6], 512  }
   0xb   :  { %484 = vsyncadd [#allocation6], 4294966784  ;;  %v531_v0 = vld [vmem:[#allocation2] sm:$0xf]  ;;  %s491_s0 = smov 32   ;;  %v492_v2 = vmov 5   ;;  %v43_v18 = vlaneseq }
   0xc   :  { %70 = vrot.lane.b32.xlu0 %v531_v0, %s491_s0  ;;  %v534_v1 = vld [vmem:[#allocation5] sm:$0xf]  ;;  %389 = vset.pattern.permute.xlu2 %v492_v2  ;;  %v493_v3 = vmov 2   ;;  %v494_v4 = vmov 0   ;;  %v495_v5 = vmov 1   ;;  %vm69_vm0 = vcmask 1047808  }
   0xd   :  { %388 = vset.pattern.permute.xlu1 %v493_v3  ;;  %65 = vperm.xlu2 %389, %v534_v1   ;;  %v496_v8 = vmov 3   ;;  %v497_v9 = vmov 4   ;;  %s498_s1 = smov 127   ;;  %s499_s21 = smov 97   ;;  %v137_v12 = vld [vmem:[#allocation5 + $0x18] sm:$0xff]  ;;  %v544_v13 = vld [vmem:[#allocation5 + $0x10] sm:$0xff] }
   0xe   :  { %60 = vperm.xlu1 %388, %v534_v1   ;;  %392 = vset.pattern.permute.xlu0 %v496_v8  ;;  %s500_s22 = smov 98   ;;  %s501_s23 = smov 126   ;;  %v546_v14 = vld [vmem:[#allocation5 + $0x8] sm:$0xff]  ;;  %v550_v15 = vld [vmem:[#allocation5] sm:$0xff]  ;;  %v44_v19 = vand.u32 127, %v43_v18  ;;  %v503_v24 = vmov 6  }
   0xf   :  { %s502_s24 = smov 118   ;;  %v504_v36 = vmov 7   ;;  %v505_v37 = vmov 8   ;;  %vm175_vm5 = vcmask 1043456   ;;  %vm166_vm6 = vcmask 31744   ;;  %s506_s25 = smov 114  }
  0x10   :  { %v49_v22 = vand.u32 15, %v44_v19  ;;  %v507_v58 = vmov 32.0   ;;  %vm208_vm7 = vcmask 261120   ;;  %s509_s26 = smov [#allocation7]   ;;  %s346_s30 = sshll.u32 %s580_s2, 4  ;;  %vm337_vm12 = vcmask 257024   ;;  %s347_s30 = int_to_ptr.hbm [resolvable:$true] %s346_s30 }
  0x11   :  { %403 = vrcp.f32 %v507_v58  ;;  %s344_s27 = sshll.u32 %s509_s26, 4  ;;  %s345_s27 = int_to_ptr.vmem [resolvable:$true] %s344_s27 }
  0x12   :  { %v76_v23 = vadd.s32 4294967294, %v49_v22  ;;  %v91_v25 = vadd.s32 4294967295, %v49_v22  ;;  %v105_v29 = vadd.s32 1, %v49_v22  ;;  %v119_v34 = vadd.s32 2, %v49_v22 }
  0x14   :  { %vm77_vm1 = vcmp.ge.s32.totalorder %v76_v23, 0  ;;  %vm92_vm2 = vcmp.ge.s32.totalorder %v91_v25, 0  ;;  %vm107_vm3 = vcmp.lt.s32.totalorder %v105_v29, 16  ;;  %vm121_vm4 = vcmp.lt.s32.totalorder %v119_v34, 16 }
  0x15   :  { %390 = vset.pattern.permute.xlu2 %v494_v4 }
  0x16   :  { %391 = vset.pattern.permute.xlu1 %v495_v5  ;;  %86 = vperm.xlu2 %390, %v534_v1  }
  0x17   :  { %100 = vperm.xlu1 %391, %v534_v1   ;;  %v404_v63 = vpop.eup %403 }
  0x18   :  { %vm227_vm8 = vweird.f32 %v404_v63 }
  0x1e   :  { %393 = vset.pattern.permute.xlu2 %v497_v9  ;;  %v223_v9 = vmul.f32 32.0, %v404_v63 }
  0x1f   :  { %396 = vset.pattern.permute.xlu1 %v503_v24 }
  0x67   :  { %v66_v16 = vpop.permute.xlu2 %65 }
  0x70   :  { %v87_v20 = vpop.permute.xlu2 %86 }
  0x7e   :  { %v71_v6 = vpop.permute.xlu0 %70 }
  0x7f   :  { %v72_v7 = vsel %vm69_vm0, %v71_v6, %v531_v0 }
  0x80   :  { %73 = vrot.lane.b32.xlu0 %v72_v7, %s491_s0  ;;  %v61_v17 = vpop.permute.xlu1 %60 }
  0x81   :  { %v63_v26 = vmul.f32 %v61_v17, %v531_v0 }
  0x83   :  { %v68_v32 = vadd.f32 %v66_v16, %v63_v26 }
  0x89   :  { %v101_v21 = vpop.permute.xlu1 %100 }
  0xf2   :  { %v74_v10 = vpop.permute.xlu0 %73 }
  0xf3   :  { %v75_v11 = vsel %vm69_vm0, %v74_v10, %v531_v0 }
  0xf4   :  { %109 = vrot.lane.b32.xlu2 %v75_v11, %s498_s1  ;;  %95 = vrot.lane.b32.xlu0 %v75_v11, %s499_s21 }
  0xf5   :  { %81 = vrot.lane.b32.xlu1 %v75_v11, %s500_s22 }
  0xfc   :  { %114 = vperm.xlu0 %392, %v534_v1   ;;  %128 = vperm.xlu2 %393, %v534_v1  }
  0xfd   :  { %123 = vrot.lane.b32.xlu1 %v75_v11, %s501_s23 }
 0x104   :  { %164 = vrot.lane.b32.xlu0 %v137_v12, %s502_s24  ;;  %162 = vrot.lane.b32.xlu2 %v544_v13, %s502_s24 }
 0x105   :  { %160 = vrot.lane.b32.xlu1 %v546_v14, %s502_s24  ;;  %395 = vset.pattern.permute.xlu0 %v503_v24 }
 0x106   :  { %394 = vset.pattern.permute.xlu2 %v503_v24 }
 0x10c   :  { %145 = vperm.xlu0 %395, %v546_v14   ;;  %140 = vperm.xlu2 %394, %v550_v15  }
 0x10d   :  { %158 = vrot.lane.b32.xlu1 %v550_v15, %s502_s24 }
 0x114   :  { %399 = vset.pattern.permute.xlu0 %v505_v37  ;;  %155 = vperm.xlu2 %394, %v137_v12  }
 0x115   :  { %150 = vperm.xlu1 %396, %v544_v13   ;;  %300 = vperm.xlu0 %399, %v137_v12  }
 0x11c   :  { %398 = vset.pattern.permute.xlu2 %v504_v36 }
 0x11d   :  { %397 = vset.pattern.permute.xlu1 %v504_v36  ;;  %288 = vperm.xlu0 %399, %v550_v15  }
 0x11e   :  { %280 = vperm.xlu1 %397, %v137_v12   ;;  %276 = vperm.xlu2 %398, %v544_v13  }
 0x126   :  { %272 = vperm.xlu1 %397, %v546_v14   ;;  %400 = vset.pattern.permute.xlu2 %v505_v37 }
 0x127   :  { %296 = vperm.xlu2 %400, %v544_v13  }
 0x12e   :  { %268 = vperm.xlu1 %397, %v550_v15  }
 0x12f   :  { %292 = vperm.xlu2 %400, %v546_v14   ;;  %v224_v14 = vsub.f32 1.0, %v223_v9 }
 0x131   :  { %v225_v17 = vmul.f32 %v404_v63, %v224_v14 }
 0x136   :  { %311 = vrot.lane.b32.xlu1 %v534_v1, %s506_s25 }
 0x14e   :  { %v110_v27 = vpop.permute.xlu2 %109 }
 0x14f   :  { %v112_v40 = vsel %vm107_vm3, %v110_v27, 0.0 }
 0x156   :  { %v129_v42 = vpop.permute.xlu2 %128 }
 0x15e   :  { %v163_v53 = vpop.permute.xlu2 %162 }
 0x166   :  { %v96_v28 = vpop.permute.xlu0 %95  ;;  %v141_v55 = vpop.permute.xlu2 %140 }
 0x167   :  { %v82_v30 = vpop.permute.xlu1 %81  ;;  %v98_v35 = vsel %vm92_vm2, %v96_v28, 0.0 }
 0x168   :  { %v84_v31 = vsel %vm77_vm1, %v82_v30, 0.0  ;;  %v103_v39 = vmul.f32 %v101_v21, %v98_v35 }
 0x169   :  { %v89_v33 = vmul.f32 %v87_v20, %v84_v31  ;;  %v226_v20 = vadd.f32 %v404_v63, %v225_v17 }
 0x16b   :  { %v90_v38 = vadd.f32 %v89_v33, %v68_v32  ;;  %v228_v23 = vsel %vm227_vm8, %v404_v63, %v226_v20 }
 0x16d   :  { %v104_v43 = vadd.f32 %v103_v39, %v90_v38 }
 0x16e   :  { %v115_v41 = vpop.permute.xlu0 %114  ;;  %v156_v62 = vpop.permute.xlu2 %155 }
 0x16f   :  { %v117_v44 = vmul.f32 %v115_v41, %v112_v40  ;;  %v124_v45 = vpop.permute.xlu1 %123 }
 0x170   :  { %v126_v46 = vsel %vm121_vm4, %v124_v45, 0.0 }
 0x171   :  { %v118_v47 = vadd.f32 %v117_v44, %v104_v43  ;;  %v131_v48 = vmul.f32 %v129_v42, %v126_v46 }
 0x173   :  { %v132_v49 = vadd.f32 %v131_v48, %v118_v47 }
 0x175   :  { %v133_v50 = vmax.f32 %v132_v49, 0.0 }
 0x176   :  { %v165_v51 = vpop.permute.xlu0 %164 }
 0x177   :  { %v161_v52 = vpop.permute.xlu1 %160  ;;  %357 = vmatpush.msk.msra.mxu0 %vm175_vm5, %v133_v50  ;;  %363 = vmatpush.msk.msra.mxu2 %vm175_vm5, %v133_v50 }
 0x178   :  { %364 = vmatpush.msk.msra.mxu3 %vm175_vm5, %v133_v50  ;;  %359 = vmatmul.msk.f32.vlgmr.msra.gmra.mxu2 %vm166_vm6, %v161_v52  ;;  %v508_v50 = vmov 9  }
 0x179   :  { %361 = vmatmul.msk.f32.vlgmr.msra.gmra.mxu3 %vm166_vm6, %v165_v51  ;;  %401 = vset.pattern.permute.xlu2 %v508_v50  ;;  %v277_v51 = vpop.permute.xlu2 %276 }
 0x17a   :  { %402 = vset.pattern.permute.xlu0 %v508_v50  ;;  %308 = vperm.xlu2 %401, %v534_v1  }
 0x17e   :  { %v146_v56 = vpop.permute.xlu0 %145 }
 0x17f   :  { %v159_v54 = vpop.permute.xlu1 %158 }
 0x180   :  { %358 = vmatmul.msk.f32.vlgmr.msra.gmra.mxu0 %vm166_vm6, %v159_v54  ;;  %360 = vmatmul.msk.f32.gmra.mxu2 %vm166_vm6, %v163_v53 }
 0x187   :  { %v151_v3 = vpop.permute.xlu1 %150 }
 0x190   :  { %v281_v49 = vpop.permute.xlu1 %280 }
 0x1fb   :  { %v199_v57 = vpop.f32.mrf.mxu2 }
 0x1fc   :  { %v200_v60 = vadd.f32 %v199_v57, %v146_v56  ;;  %v205_v2 = vpop.f32.mrf.mxu3 }
 0x1fd   :  { %v196_v59 = vpop.f32.mrf.mxu0  ;;  %v206_v7 = vadd.f32 %v205_v2, %v156_v62 }
 0x1fe   :  { %v197_v61 = vadd.f32 %v196_v59, %v141_v55  ;;  %v210_v4 = vsel %vm208_vm7, %v200_v60, 0.0  ;;  %v273_v55 = vpop.permute.xlu1 %272  ;;  %v297_v59 = vpop.permute.xlu2 %296 }
 0x1ff   :  { %v214_v13 = vsel %vm208_vm7, %v206_v7, 0.0 }
 0x200   :  { %v209_v5 = vsel %vm208_vm7, %v197_v61, 0.0 }
 0x201   :  { %v211_v10 = vadd.f32 %v210_v4, %v209_v5 }
 0x203   :  { %v202_v6 = vpop.f32.mrf.mxu2 }
 0x204   :  { %v203_v8 = vadd.f32 %v202_v6, %v151_v3 }
 0x206   :  { %v212_v11 = vsel %vm208_vm7, %v203_v8, 0.0  ;;  %v269_v1 = vpop.permute.xlu1 %268 }
 0x207   :  { %v213_v12 = vadd.f32 %v212_v11, %v211_v10  ;;  %v293_v10 = vpop.permute.xlu2 %292 }
 0x209   :  { %v215_v15 = vadd.f32 %v214_v13, %v213_v12 }
 0x20b   :  { %v216_v16 = vrot.slane %v215_v15, 4 }
 0x20d   :  { %v217_v18 = vadd.f32 %v216_v16, %v215_v15 }
 0x20e   :  { %v312_v14 = vpop.permute.xlu1 %311 }
 0x20f   :  { %v218_v19 = vrot.slane %v217_v18, 2  ;;  %v309_v15 = vpop.permute.xlu2 %308 }
 0x211   :  { %v219_v21 = vadd.f32 %v218_v19, %v217_v18 }
 0x213   :  { %v220_v22 = vrot.slane %v219_v21, 1 }
 0x215   :  { %v221_v24 = vadd.f32 %v220_v22, %v219_v21 }
 0x217   :  { %v229_v25 = vmul.f32 %v228_v23, %v221_v24 }
 0x219   :  { %v230_v26 = vsub.f32 %v197_v61, %v229_v25  ;;  %v231_v27 = vsub.f32 %v200_v60, %v229_v25  ;;  %v232_v28 = vsub.f32 %v203_v8, %v229_v25  ;;  %v233_v29 = vsub.f32 %v206_v7, %v229_v25  ;;  %v301_v61 = vpop.permute.xlu0 %300 }
 0x21b   :  { %v234_v30 = vmul.f32 %v230_v26, %v230_v26  ;;  %v235_v31 = vmul.f32 %v231_v27, %v231_v27  ;;  %v236_v32 = vmul.f32 %v232_v28, %v232_v28  ;;  %v237_v35 = vmul.f32 %v233_v29, %v233_v29 }
 0x21d   :  { %v238_v33 = vsel %vm208_vm7, %v234_v30, 0.0  ;;  %v239_v34 = vsel %vm208_vm7, %v235_v31, 0.0  ;;  %v241_v37 = vsel %vm208_vm7, %v236_v32, 0.0  ;;  %v243_v39 = vsel %vm208_vm7, %v237_v35, 0.0 }
 0x21e   :  { %v240_v36 = vadd.f32 %v239_v34, %v238_v33 }
 0x220   :  { %v242_v38 = vadd.f32 %v241_v37, %v240_v36 }
 0x221   :  { %v289_v12 = vpop.permute.xlu0 %288 }
 0x222   :  { %v244_v40 = vadd.f32 %v243_v39, %v242_v38 }
 0x224   :  { %v245_v41 = vrot.slane %v244_v40, 4 }
 0x226   :  { %v246_v42 = vadd.f32 %v245_v41, %v244_v40 }
 0x228   :  { %v247_v43 = vrot.slane %v246_v42, 2 }
 0x22a   :  { %v248_v44 = vadd.f32 %v247_v43, %v246_v42 }
 0x22c   :  { %v249_v45 = vrot.slane %v248_v44, 1 }
 0x22e   :  { %v250_v46 = vadd.f32 %v249_v45, %v248_v44 }
 0x230   :  { %v251_v47 = vmul.f32 %v250_v46, %v228_v23 }
 0x232   :  { %v252_v48 = vadd.f32 1e-05, %v251_v47 }
 0x234   :  { %405 = vrsqrt.f32 %v252_v48  ;;  %vm259_vm10 = vweird.f32 %v252_v48 }
 0x23a   :  { %v406_v52 = vpop.eup %405 }
 0x23b   :  { %v254_v53 = vmul.f32 %v406_v52, %v252_v48  ;;  %vm260_vm9 = vweird.f32 %v406_v52 }
 0x23c   :  { %vm261_vm11 = vmor %vm259_vm10, %vm260_vm9 }
 0x23d   :  { %v255_v54 = vmul.f32 %v406_v52, %v254_v53 }
 0x23f   :  { %v256_v56 = vmul.f32 0.5, %v255_v54 }
 0x241   :  { %v257_v57 = vsub.f32 1.5, %v256_v56 }
 0x243   :  { %v258_v58 = vmul.f32 %v406_v52, %v257_v57 }
 0x245   :  { %v262_v60 = vsel %vm261_vm11, %v406_v52, %v258_v58 }
 0x246   :  { %v266_v62 = vmul.f32 %v262_v60, %v233_v29  ;;  %v264_v63 = vmul.f32 %v262_v60, %v231_v27  ;;  %v265_v2 = vmul.f32 %v262_v60, %v232_v28  ;;  %v263_v5 = vmul.f32 %v262_v60, %v230_v26 }
 0x248   :  { %v286_v3 = vmul.f32 %v281_v49, %v266_v62  ;;  %v285_v4 = vmul.f32 %v277_v51, %v265_v2  ;;  %v284_v6 = vmul.f32 %v273_v55, %v264_v63  ;;  %v283_v8 = vmul.f32 %v269_v1, %v263_v5 }
 0x24a   :  { %v306_v7 = vadd.f32 %v301_v61, %v286_v3  ;;  %v305_v9 = vadd.f32 %v297_v59, %v285_v4  ;;  %v304_v11 = vadd.f32 %v293_v10, %v284_v6  ;;  %v303_v13 = vadd.f32 %v289_v12, %v283_v8 }
 0x24c   :  { %327 = vmatpush.msra.mxu1 %v306_v7 }
 0x24e   :  { %328 = vmatpush.msra.mxu1 %v305_v9 }
 0x250   :  { %329 = vmatpush.msra.mxu1 %v304_v11 }
 0x252   :  { %330 = vmatpush.msra.mxu1 %v303_v13 }
 0x253   :  { %362 = vmatmul.msk.f32.vlgmr.msra.gmra.mxu1 %vm208_vm7, %v312_v14 }
 0x2d0   :  { %v332_v16 = vpop.f32.mrf.mxu1 }
 0x2d1   :  { %v333_v17 = vadd.f32 %v332_v16, %v309_v15 }
 0x2d3   :  { %407 = vtanh.f32 %v333_v17 }
 0x2d9   :  { %v408_v18 = vpop.eup %407 }
 0x2da   :  { %v336_v19 = vadd.f32 %v408_v18, %v531_v0 }
 0x2dc   :  { %338 = vst.msk [vmem:[#allocation7] sm:$0xf] %vm337_vm12, %v336_v19 }
 0x2dd   :  { %349 = dma.vmem_to_hbm [thread:$0]  %s345_s27, 64, %s347_s30, [#allocation4]  }
 0x2de   :  { %485 = dma.done.wait [#allocation4], 64  }
 0x2df   :  { %486 = vsyncadd [#allocation4], 4294967232 }
 0x2e0   :  { %354 = vsyncpa [#allocation3], 1 }
 0x2e1   :  { %355 = vsyncpa [#allocation6], 1 }
 0x2e2   :  { %356 = vsyncpa [#allocation4], 1 }

</bundles_post_ra>
